<compile_context>
chip_gen: v6e
topology: v6e:2x2x1
jax: 0.10.0
libtpu: 0.0.40
codegen_flags: <defaults>
</compile_context>

<pallas_src>
import math

import jax
import jax.numpy as jnp
from jax.experimental import pallas as pl
from jax.experimental.pallas import tpu as pltpu


def _toy_model_kernel(x_ref, w1_ref, b1_ref, w2_ref, b2_ref, out_ref, acc_ref):
    # x_ref  : (TB, TD)  bf16 tile of the flattened feature
    # w1_ref : (TD, 2H)  bf16 tile of the fused first-layer weights
    # b1_ref : (1, 2H)   f32 fused first-layer bias
    # w2_ref : (2H, C)   f32 fused second-layer weights (domain half pre-scaled by 2)
    # b2_ref : (1, C)    f32 fused second-layer bias (b2l + 2*b2d)
    # out_ref: (TB, C)   f32
    # acc_ref: (TB, 2H)  f32 VMEM accumulator (pre-activation hidden state)
    k = pl.program_id(1)

    @pl.when(k == 0)
    def _init():
        acc_ref[...] = jnp.zeros_like(acc_ref)

    acc_ref[...] += jnp.dot(x_ref[...], w1_ref[...],
                            preferred_element_type=jnp.float32)

    @pl.when(k == pl.num_programs(1) - 1)
    def _finalize():
        # sigmoid: exp on the EUP; approx reciprocal also on the EUP slot
        t = jnp.exp(-(acc_ref[...] + b1_ref[...]))
        h = pl.reciprocal(1.0 + t, approx=True)
        out_ref[...] = (jnp.dot(h, w2_ref[...], preferred_element_type=jnp.float32)
                        + b2_ref[...]).astype(out_ref.dtype)


def _round_up(x, m):
    return ((x + m - 1) // m) * m


def _vmem_budget_bytes():
    """Generation-aware VMEM budget (v5e/v6e: 128 MiB physical, v7x: 64 MiB)."""
    try:
        cap = pltpu.get_tpu_info().vmem_capacity_bytes
    except Exception:
        cap = 64 * 1024 * 1024          # conservative fallback, safe on all gens
    return int(cap * 0.7)


def toy_model_forward(src_x, params, *, max_tile_b=512, max_tile_d=2048):
    """ToyModel.forward(src_x, train_mode='summary') with an identity encoder.

    src_x: (B, input_dim, seq_length). Returns (B, num_classes) logits sum.
    """
    w1l, b1l, w2l, b2l, w1d, b1d, w2d, b2d = params
    B = src_x.shape[0]
    D = int(math.prod(src_x.shape[1:]))
    H = w1l.shape[1]
    C = w2l.shape[1]
    assert w1l.shape == (D, H) and w1d.shape == (D, H)
    H2 = 2 * H

    # ---- fuse label/domain branches into single weight streams --------------
    w1 = jnp.concatenate([w1l, w1d], axis=1)                 # (D, 2H)
    b1 = jnp.concatenate([b1l, b1d], axis=1)                 # (1, 2H)
    # src_feature == tgt_feature  =>  src_dom + tgt_dom == 2 * dom_logits,
    # so fold the factor 2 into the domain half of the fused second layer.
    w2 = jnp.concatenate([w2l, 2.0 * w2d], axis=0)           # (2H, C)
    b2 = b2l + 2.0 * b2d                                     # (1, C)

    xf = src_x.reshape(B, D)   # encoder == identity; classifiers flatten anyway

    # ---- tile selection ------------------------------------------------------
    budget = _vmem_budget_bytes()
    B8 = _round_up(B, 8)
    if B8 >= 16:
        # guarantee >= 2 batch blocks so the "parallel" axis spans both v7x cores
        TB = max(8, min(max_tile_b, (B8 // 2) // 8 * 8))
    else:
        TB = B8
    B_pad = _round_up(B8, TB)

    D128 = _round_up(D, 128)

    def vmem_use(td):
        x_bytes = 2 * TB * td * 2            # bf16 x tile, double-buffered
        w1_bytes = 2 * td * H2 * 2           # bf16 fused W1 tile, double-buffered
        acc_bytes = TB * H2 * 4              # resident f32 accumulator
        out_bytes = 2 * TB * C * 4
        small = 2 * (H2 * C + H2 + C) * 4    # fused W2 / biases
        return x_bytes + w1_bytes + acc_bytes + out_bytes + small

    TD = max(128, min((_round_up(max_tile_d, 128)), D128))
    TD = (TD // 128) * 128
    while TD > 128 and vmem_use(TD) > budget:
        TD -= 128
    D_pad = _round_up(D, TD)

    # ---- zero-pad to tile alignment (numerically exact for the matmul) ------
    if (B_pad, D_pad) != (B, D):
        xf = jnp.pad(xf, ((0, B_pad - B), (0, D_pad - D)))
    if D_pad != D:
        w1 = jnp.pad(w1, ((0, D_pad - D), (0, 0)))

    # the two dominant HBM streams run in bf16; accumulation stays f32
    xf = xf.astype(jnp.bfloat16)
    w1 = w1.astype(jnp.bfloat16)

    grid = (B_pad // TB, D_pad // TD)

    flops = 2 * B_pad * D_pad * H2 + 2 * B_pad * H2 * C
    transcendentals = 2 * B_pad * H2                       # exp + approx reciprocal
    bytes_accessed = (B_pad * D_pad * 2                    # x (bf16)
                      + grid[0] * D_pad * H2 * 2           # W1 restreamed per batch block
                      + (H2 * C + H2 + C) * 4              # fused W2 / biases
                      + B_pad * C * 4)                     # output

    out = pl.pallas_call(
        _toy_model_kernel,
        out_shape=jax.ShapeDtypeStruct((B_pad, C), jnp.float32),
        grid=grid,
        in_specs=[
            pl.BlockSpec((TB, TD), lambda i, k: (i, k)),    # x tile
            pl.BlockSpec((TD, H2), lambda i, k: (k, 0)),    # fused W1 tile
            pl.BlockSpec((1, H2), lambda i, k: (0, 0)),     # fused b1
            pl.BlockSpec((H2, C), lambda i, k: (0, 0)),     # fused W2 (dom x2)
            pl.BlockSpec((1, C), lambda i, k: (0, 0)),      # fused b2
        ],
        out_specs=pl.BlockSpec((TB, C), lambda i, k: (i, 0)),
        scratch_shapes=[pltpu.VMEM((TB, H2), jnp.float32)],
        compiler_params=pltpu.CompilerParams(
            dimension_semantics=("parallel", "arbitrary"),
            vmem_limit_bytes=max(budget, 32 * 1024 * 1024)),
        cost_estimate=pl.CostEstimate(
            flops=flops, transcendentals=transcendentals,
            bytes_accessed=bytes_accessed),
    )(xf, w1, b1, w2, b2)
    return out[:B]


def toy_model_ref(src_x, params):
    """Pure-JAX f32 reference (matches PyTorch forward with identity encoder)."""
    w1l, b1l, w2l, b2l, w1d, b1d, w2d, b2d = params
    B = src_x.shape[0]
    xf = src_x.reshape(B, -1)
    h_l = 1.0 / (1.0 + jnp.exp(-(xf @ w1l + b1l)))
    cls_logits = h_l @ w2l + b2l
    h_d = 1.0 / (1.0 + jnp.exp(-(xf @ w1d + b1d)))
    dom_logits = h_d @ w2d + b2d
    return cls_logits + dom_logits + dom_logits    # src_cls + src_dom + tgt_dom


def init_params(input_dim, seq_length, hidden_dim, num_classes, key):
    """kaiming_normal (fan_in, gain=sqrt(2)) weights, zero bias, like the module.
    First-layer weights stored transposed (in, out) relative to torch Linear."""
    D = input_dim * seq_length
    ks = jax.random.split(key, 4)

    def kaiming(k, fan_in, shape):
        return jax.random.normal(k, shape, jnp.float32) * jnp.sqrt(2.0 / fan_in)

    w1l = kaiming(ks[0], D, (D, hidden_dim))
    b1l = jnp.zeros((1, hidden_dim), jnp.float32)
    w2l = kaiming(ks[1], hidden_dim, (hidden_dim, num_classes))
    b2l = jnp.zeros((1, num_classes), jnp.float32)
    w1d = kaiming(ks[2], D, (D, hidden_dim))
    b1d = jnp.zeros((1, hidden_dim), jnp.float32)
    w2d = kaiming(ks[3], hidden_dim, (hidden_dim, num_classes))
    b2d = jnp.zeros((1, num_classes), jnp.float32)
    return (w1l, b1l, w2l, b2l, w1d, b1d, w2d, b2d)


if __name__ == "__main__":
    # Small shapes consistent with the module (defaults scaled down):
    # batch=2, input_dim=4, seq_length=64 -> fc_input_dim=256, hidden=32, classes=2
    B, input_dim, seq_length = 2, 4, 64
    hidden_dim, num_classes = 32, 2

    key = jax.random.PRNGKey(0)
    kx, kp = jax.random.split(key)
    src_x = jax.random.normal(kx, (B, input_dim, seq_length), jnp.float32)
    params = init_params(input_dim, seq_length, hidden_dim, num_classes, kp)

    # max_tile_d=128 forces a 2-step reduction so the accumulator path is exercised
    out = toy_model_forward(src_x, params, max_tile_d=128)
    out = jax.block_until_ready(out)

    ref = toy_model_ref(src_x, params)
    assert out.shape == (B, num_classes), out.shape
    # x / fused-W1 streams run in bf16 (f32 accumulation) -> relaxed tolerance
    assert jnp.allclose(out, ref, rtol=2e-2, atol=2e-2), (out, ref)

    print("KERNEL_OK")
</pallas_src>

<mosaic_0001>
module attributes {stable_mosaic.version = 11 : i64} {
  func.func @_toy_model_kernel(%arg0: i32, %arg1: i32, %arg2: memref<8x128xbf16, #tpu.memory_space<vmem>>, %arg3: memref<128x64xbf16, #tpu.memory_space<vmem>>, %arg4: memref<1x64xf32, #tpu.memory_space<vmem>>, %arg5: memref<64x2xf32, #tpu.memory_space<vmem>>, %arg6: memref<1x2xf32, #tpu.memory_space<vmem>>, %arg7: memref<8x2xf32, #tpu.memory_space<vmem>>, %arg8: memref<8x64xf32, #tpu.memory_space<vmem>>) attributes {dimension_semantics = [#tpu.dimension_semantics<parallel>, #tpu.dimension_semantics<arbitrary>], iteration_bounds = array<i64: 1, 2>, scalar_prefetch = 0 : i64, scratch_operands = 1 : i64, tpu.core_type = #tpu.core_type<tc>, window_params = [{transform_indices = @transform_0, window_bounds = array<i64: 8, 128>}, {transform_indices = @transform_1, window_bounds = array<i64: 128, 64>}, {pipeline_mode = #tpu.pipeline_mode<synchronous>, transform_indices = @transform_2, window_bounds = array<i64: 1, 64>}, {pipeline_mode = #tpu.pipeline_mode<synchronous>, transform_indices = @transform_3, window_bounds = array<i64: 64, 2>}, {pipeline_mode = #tpu.pipeline_mode<synchronous>, transform_indices = @transform_4, window_bounds = array<i64: 1, 2>}, {transform_indices = @transform_5, window_bounds = array<i64: 8, 2>}]} {
    %c0_i32 = arith.constant 0 : i32
    %0 = arith.cmpi eq, %arg1, %c0_i32 : i32
    %1 = arith.extui %0 : i1 to i32
    %c0_i32_0 = arith.constant 0 : i32
    %2 = arith.cmpi ne, %1, %c0_i32_0 : i32
    scf.if %2 {
      %cst_9 = arith.constant 0.000000e+00 : f32
      %12 = vector.broadcast %cst_9 : f32 to vector<8x64xf32>
      %c0_10 = arith.constant 0 : index
      %c0_11 = arith.constant 0 : index
      %13 = vector.load %arg8[%c0_10, %c0_11] : memref<8x64xf32, #tpu.memory_space<vmem>>, vector<8x64xf32>
      tpu.vector_store %arg8[%c0_10, %c0_11], %12 {strides = array<i32>} : memref<8x64xf32, #tpu.memory_space<vmem>>, vector<8x64xf32>,
    } else {
    }
    %c0 = arith.constant 0 : index
    %c0_1 = arith.constant 0 : index
    %3 = vector.load %arg8[%c0, %c0_1] : memref<8x64xf32, #tpu.memory_space<vmem>>, vector<8x64xf32>
    %c0_2 = arith.constant 0 : index
    %c0_3 = arith.constant 0 : index
    %4 = vector.load %arg2[%c0_2, %c0_3] : memref<8x128xbf16, #tpu.memory_space<vmem>>, vector<8x128xbf16>
    %c0_4 = arith.constant 0 : index
    %c0_5 = arith.constant 0 : index
    %5 = vector.load %arg3[%c0_4, %c0_5] : memref<128x64xbf16, #tpu.memory_space<vmem>>, vector<128x64xbf16>
    %cst = arith.constant dense<0.000000e+00> : vector<8x64xf32>
    %6 = tpu.matmul %4, %5, %cst {dimension_numbers = #tpu.dot_dimension_numbers<[1], [0], [0], [1], [0, 0, 1, 1], [], []>} : vector<8x128xbf16>, vector<128x64xbf16>, vector<8x64xf32> -> vector<8x64xf32>
    %7 = arith.addf %3, %6 : vector<8x64xf32>
    %c0_6 = arith.constant 0 : index
    %c0_7 = arith.constant 0 : index
    %8 = vector.load %arg8[%c0_6, %c0_7] : memref<8x64xf32, #tpu.memory_space<vmem>>, vector<8x64xf32>
    tpu.vector_store %arg8[%c0_6, %c0_7], %7 {strides = array<i32>} : memref<8x64xf32, #tpu.memory_space<vmem>>, vector<8x64xf32>,
    %c1_i32 = arith.constant 1 : i32
    %9 = arith.cmpi eq, %arg1, %c1_i32 : i32
    %10 = arith.extui %9 : i1 to i32
    %c0_i32_8 = arith.constant 0 : i32
    %11 = arith.cmpi ne, %10, %c0_i32_8 : i32
    scf.if %11 {
      %c0_9 = arith.constant 0 : index
      %c0_10 = arith.constant 0 : index
      %12 = vector.load %arg8[%c0_9, %c0_10] : memref<8x64xf32, #tpu.memory_space<vmem>>, vector<8x64xf32>
      %c0_11 = arith.constant 0 : index
      %c0_12 = arith.constant 0 : index
      %13 = vector.load %arg4[%c0_11, %c0_12] : memref<1x64xf32, #tpu.memory_space<vmem>>, vector<1x64xf32>
      %14 = vector.broadcast %13 : vector<1x64xf32> to vector<8x64xf32>
      %15 = arith.addf %12, %14 : vector<8x64xf32>
      %cst_13 = arith.constant 0.000000e+00 : f32
      %16 = vector.broadcast %cst_13 : f32 to vector<8x64xf32>
      %17 = arith.subf %16, %15 : vector<8x64xf32>
      %18 = math.exp %17 : vector<8x64xf32>
      %cst_14 = arith.constant 1.000000e+00 : f32
      %19 = vector.broadcast %cst_14 : f32 to vector<8x64xf32>
      %20 = arith.addf %19, %18 : vector<8x64xf32>
      %21 = tpu.reciprocal %20 {approx = true} : vector<8x64xf32> -> vector<8x64xf32>
      %c0_15 = arith.constant 0 : index
      %c0_16 = arith.constant 0 : index
      %22 = vector.load %arg5[%c0_15, %c0_16] : memref<64x2xf32, #tpu.memory_space<vmem>>, vector<64x2xf32>
      %cst_17 = arith.constant dense<0.000000e+00> : vector<8x2xf32>
      %23 = tpu.matmul %21, %22, %cst_17 {dimension_numbers = #tpu.dot_dimension_numbers<[1], [0], [0], [1], [0, 0, 1, 1], [], []>} : vector<8x64xf32>, vector<64x2xf32>, vector<8x2xf32> -> vector<8x2xf32>
      %c0_18 = arith.constant 0 : index
      %c0_19 = arith.constant 0 : index
      %24 = vector.load %arg6[%c0_18, %c0_19] : memref<1x2xf32, #tpu.memory_space<vmem>>, vector<1x2xf32>
      %25 = vector.broadcast %24 : vector<1x2xf32> to vector<8x2xf32>
      %26 = arith.addf %23, %25 : vector<8x2xf32>
      %c0_20 = arith.constant 0 : index
      %c0_21 = arith.constant 0 : index
      %27 = vector.load %arg7[%c0_20, %c0_21] : memref<8x2xf32, #tpu.memory_space<vmem>>, vector<8x2xf32>
      tpu.vector_store %arg7[%c0_20, %c0_21], %26 {strides = array<i32>} : memref<8x2xf32, #tpu.memory_space<vmem>>, vector<8x2xf32>,
    } else {
    }
    return
  }
  func.func @transform_0(%arg0: i32, %arg1: i32) -> (i32, i32) {
    %c0_i32 = arith.constant 0 : i32
    return %arg0, %arg1 : i32, i32
  }
  func.func @transform_1(%arg0: i32, %arg1: i32) -> (i32, i32) {
    %c0_i32 = arith.constant 0 : i32
    %c0_i32_0 = arith.constant 0 : i32
    return %arg1, %c0_i32 : i32, i32
  }
  func.func @transform_2(%arg0: i32, %arg1: i32) -> (i32, i32) {
    %c0_i32 = arith.constant 0 : i32
    %c0_i32_0 = arith.constant 0 : i32
    %c0_i32_1 = arith.constant 0 : i32
    return %c0_i32, %c0_i32_0 : i32, i32
  }
  func.func @transform_3(%arg0: i32, %arg1: i32) -> (i32, i32) {
    %c0_i32 = arith.constant 0 : i32
    %c0_i32_0 = arith.constant 0 : i32
    %c0_i32_1 = arith.constant 0 : i32
    return %c0_i32, %c0_i32_0 : i32, i32
  }
  func.func @transform_4(%arg0: i32, %arg1: i32) -> (i32, i32) {
    %c0_i32 = arith.constant 0 : i32
    %c0_i32_0 = arith.constant 0 : i32
    %c0_i32_1 = arith.constant 0 : i32
    return %c0_i32, %c0_i32_0 : i32, i32
  }
  func.func @transform_5(%arg0: i32, %arg1: i32) -> (i32, i32) {
    %c0_i32 = arith.constant 0 : i32
    %c0_i32_0 = arith.constant 0 : i32
    return %arg0, %c0_i32 : i32, i32
  }
}

</mosaic_0001>

<bundles_post_ra>
// kernel: tpu_custom_call.1
= control target key start
LH: loop header
LB: loop body
LE: loop exit
PB: predicated region body
PF: predicated region fallthrough
CT: control target
= control target key end

     0   :  { %s749_s18 = smov 0   ;;  %s751_s19 = smov 0   ;;  %s837_s0 = inlined_call_operand.vmem [shape: bf16[8,256], index: 0, kind: input, shape index: {}]   ;;  %s838_s1 = inlined_call_operand.vmem [shape: bf16[256,64], index: 1, kind: input, shape index: {}]   ;;  %s839_s2 = inlined_call_operand.vmem [shape: f32[1,64], index: 2, kind: input, shape index: {}]   ;;  %s840_s3 = inlined_call_operand.vmem [shape: f32[64,2], index: 3, kind: input, shape index: {}]   ;;  %s841_s4 = inlined_call_operand.vmem [shape: f32[1,2], index: 4, kind: input, shape index: {}]   ;;  %s842_s5 = inlined_call_operand.vmem [shape: f32[8,2], index: 5, kind: output, shape index: {}]  }
   0x1   :  { %s753_s20 = smov 0  }
   0x2 LB: > { %s24_s21 = sadd.s32 1, %s708_s19  ;;  %p572_p0 = scmp.ge.s32.totalorder %s712_s20, 1  ;;  %s712_s20 = sphi %s753_s20, %s15_s20   ;;  %s708_s19 = sphi %s751_s19, %s844_s19   ;;  %s704_s18 = sphi %s749_s18, %s843_s18  }
   0x3   : > { %p25_p1 = scmp.ge.s32.totalorder %s24_s21, 2  ;;  %p215_p2 = scmp.lt.s32.totalorder %s712_s20, 3 }
   0x5   : > { %s846_s21 = smov (%p25_p1, %s24_s21), 0  ;;  %p216_p3 = pnand %p572_p0, %p215_p2 }
   0x6   : > { %p252_p4 = scmp.lt.s32.totalorder (!%p216_p3), %s704_s18, 1  ;;  %s574_s22 = sshll.u32 (!%p216_p3), %s704_s18, 4 }
   0x7   : > { %219 = sbr.rel (%p216_p3) target bundleno = 488 (0x1e8), region = 40  ;;  %p259_p5 = scmp.lt.s32.totalorder (!%p216_p3), %s574_s22, 31 }
   0x8   : > { %p576_p6 = scmp.ne.s32.totalorder (!%p216_p3), %s704_s18, 0 }
   0xc   : > { %s253_s23 = scalar_select %p252_p4, %s704_s18, 1 }
   0xd   : > { %s848_s22 = smov (!%p259_p5, %s574_s22), 31  ;;  %272 = sbr.rel (%p576_p6) target bundleno = 20 (0x14), region = 44 }
   0xe   : > { %s573_s24 = sshll.u32 %s253_s23, 2  ;;  %s575_s28 = sshll.u32 %s848_s22, 2 }
   0xf   : > { %s775_s27 = scalar_lea.vmem %s837_s0, %s573_s24  ;;  %s780_s6 = scalar_lea.vmem %s838_s1, %s575_s28 }
  0x12   : > { %vm273_vm0 = vcmask 523264   ;;  %v714_v0 = vmov 0.0  }
  0x13   : > { %274 = vst.msk [vmem:[#allocation2] sm:$0xff] %vm273_vm0, %v714_v0 }
  0x14 PF: > { %v678_v1 = vld [vmem:[%s780_s6 + $0x38] sm:$0xff]   ;;  %v715_v2 = vmov 0.0   ;;  %v679_v3 = vld [vmem:[%s780_s6 + $0x30] sm:$0xff]   ;;  %vm716_vm1 = vmmov 0   ;;  %v680_v4 = vld [vmem:[%s780_s6 + $0x28] sm:$0xff]   ;;  %vm382_vm2 = vcmask 523264  }
  0x15   : > { %610 = vmatprep.subr.bf16.mxu0 %v715_v2  ;;  %626 = vmatprep.mubr.msk.bf16.mxu0 %vm716_vm1, %v715_v2  ;;  %v681_v5 = vld [vmem:[%s780_s6 + $0x20] sm:$0xff]   ;;  %v682_v6 = vld [vmem:[%s780_s6 + $0x18] sm:$0xff]   ;;  %v683_v7 = vld [vmem:[%s780_s6 + $0x10] sm:$0xff]   ;;  %p585_p7 = scmp.ne.s32.totalorder %s704_s18, 1 }
  0x16   : > { %611 = vmatpush3.bf16.msra.mxu0 %v678_v1  ;;  %v684_v8 = vld [vmem:[%s780_s6 + $0x8] sm:$0xff]   ;;  %v685_v9 = vld [vmem:[%s780_s6] sm:$0xff]  }
  0x17   : > { %612 = vmatprep.subr.bf16.mxu0 %v715_v2  ;;  %v276_v10 = vld [vmem:[%s775_s27] sm:$0xf] }
  0x1a   : > { %613 = vmatpush3.bf16.msra.mxu0 %v679_v3  ;;  %v275_v11 = vld [vmem:[#allocation2] sm:$0xff] }
  0x1b   : > { %614 = vmatprep.subr.bf16.mxu0 %v715_v2 }
  0x1e   : > { %615 = vmatpush3.bf16.msra.mxu0 %v680_v4 }
  0x1f   : > { %616 = vmatprep.subr.bf16.mxu0 %v715_v2 }
  0x22   : > { %617 = vmatpush3.bf16.msra.mxu0 %v681_v5 }
  0x23   : > { %618 = vmatprep.subr.bf16.mxu0 %v715_v2 }
  0x26   : > { %619 = vmatpush3.bf16.msra.mxu0 %v682_v6 }
  0x27   : > { %620 = vmatprep.subr.bf16.mxu0 %v715_v2 }
  0x2a   : > { %621 = vmatpush3.bf16.msra.mxu0 %v683_v7 }
  0x2b   : > { %622 = vmatprep.subr.bf16.mxu0 %v715_v2 }
  0x2e   : > { %623 = vmatpush3.bf16.msra.mxu0 %v684_v8 }
  0x2f   : > { %624 = vmatprep.subr.bf16.mxu0 %v715_v2 }
  0x32   : > { %625 = vmatpush3.bf16.msra.mxu0 %v685_v9 }
  0x35   : > { %627 = vmatmul.mubr.bf16.vlgmr.msra.gmra.mxu0 %v276_v10 }
  0xf5   : > { %v375_v12 = vpop.f32.mrf.mxu0 }
  0xf6   : > { %v381_v13 = vadd.f32 %v375_v12, %v275_v11 }
  0xf7   : > { %v628_v14 = vpop.f32.mrf.mxu0  ;;  %387 = sbr.rel (%p585_p7) target bundleno = 488 (0x1e8), region = 48 }
  0xf8   : > { %383 = vst.msk [vmem:[#allocation2] sm:$0xff] %vm382_vm2, %v381_v13 }
  0xf9   : > { %v378_v15 = vpop.f32.mrf.mxu0 }
  0xfb   : > { %v629_v16 = vpop.f32.mrf.mxu0 }
  0xfc   : > { %v409_v17 = vld [vmem:[%s840_s3 + $0x38] sm:$0xff]  ;;  %v717_v18 = vmov 0.0   ;;  %v408_v19 = vld [vmem:[%s840_s3 + $0x30] sm:$0xff]  ;;  %vm718_vm3 = vmmov 0   ;;  %v407_v21 = vld [vmem:[%s840_s3 + $0x28] sm:$0xff]  ;;  %vm490_vm4 = vcmask 15360  }
  0xfd   : > { %630 = vmatprep.subr.mxu0 %v717_v18  ;;  %646 = vmatprep.mubr.msk.f32.mxu0 %vm718_vm3, %v717_v18  ;;  %v586_v22 = vld [vmem:[%s839_s2] ss:$0 sm:$0xff]  ;;  %v405_v26 = vld [vmem:[%s840_s3 + $0x18] sm:$0xff]  ;;  %v404_v28 = vld [vmem:[%s840_s3 + $0x10] sm:$0xff] }
  0xfe   : > { %631 = vmatpush3.msra.mxu0 %v409_v17  ;;  %v406_v24 = vld [vmem:[%s840_s3 + $0x20] sm:$0xff]  ;;  %v403_v29 = vld [vmem:[%s840_s3 + $0x8] sm:$0xff] }
  0xff   : > { %v388_v20 = vld [vmem:[#allocation2] sm:$0xff]  ;;  %632 = vmatprep.subr.mxu0 %v717_v18 }
 0x100   : > { %633 = vmatpush3.msra.mxu0 %v408_v19  ;;  %v396_v23 = vadd.f32 %v586_v22, %v388_v20  ;;  %v402_v30 = vld [vmem:[%s840_s3] sm:$0xff] }
 0x101   : > { %634 = vmatprep.subr.mxu0 %v717_v18  ;;  %v587_v34 = vld [vmem:[%s841_s4] ss:$0 sm:$0xff] }
 0x102   : > { %635 = vmatpush3.msra.mxu0 %v407_v21  ;;  %v397_v25 = vsub.f32 0.0, %v396_v23 }
 0x103   : > { %636 = vmatprep.subr.mxu0 %v717_v18 }
 0x104   : > { %637 = vmatpush3.msra.mxu0 %v406_v24  ;;  %v398_v27 = vmul.f32 1.442695, %v397_v25 }
 0x105   : > { %638 = vmatprep.subr.mxu0 %v717_v18 }
 0x106   : > { %639 = vmatpush3.msra.mxu0 %v405_v26  ;;  %686 = vpow2.f32 %v398_v27 }
 0x107   : > { %640 = vmatprep.subr.mxu0 %v717_v18 }
 0x108   : > { %641 = vmatpush3.msra.mxu0 %v404_v28 }
 0x109   : > { %642 = vmatprep.subr.mxu0 %v717_v18 }
 0x10a   : > { %643 = vmatpush3.msra.mxu0 %v403_v29 }
 0x10b   : > { %644 = vmatprep.subr.mxu0 %v717_v18 }
 0x10c   : > { %645 = vmatpush3.msra.mxu0 %v402_v30 }
 0x113   : > { %v687_v31 = vpop.eup %686 }
 0x114   : > { %v400_v32 = vadd.f32 1.0, %v687_v31 }
 0x116   : > { %688 = vrcp.f32 %v400_v32 }
 0x123   : > { %v689_v33 = vpop.eup %688 }
 0x124   : > { %647 = vmatmul.mubr.msk.f32.vlgmr.msra.gmra.mxu0 %vm382_vm2, %v689_v33 }
 0x1e4   : > { %v486_v35 = vpop.f32.mrf.mxu0 }
 0x1e5   : > { %v487_v36 = vadd.f32 %v587_v34, %v486_v35 }
 0x1e6   : > { %v648_v37 = vpop.f32.mrf.mxu0 }
 0x1e7   : > { %491 = vst.msk [vmem:[%s842_s5] sm:$0xff] %vm490_vm4, %v487_v36 }
 0x1e8 PF: > { %s15_s20 = sadd.s32 1, %s712_s20   ;;  %s843_s18 = smov %s708_s19 }
 0x1e9   : > { %p12_p8 = scmp.ge.s32.totalorder %s15_s20, 4   ;;  %s844_s19 = smov %s846_s21 }
 0x1eb   :  { %14 = sbr.rel (!%p12_p8) target bundleno = 2 (0x2), region = 81 }

</bundles_post_ra>
